<compile_context>
chip_gen: v7x
topology: tpu7x:2x2x1
jax: 0.10.0
libtpu: 0.0.40
codegen_flags: <defaults>
</compile_context>

<pallas_src>
import functools
import math

import jax
import jax.numpy as jnp
from jax import lax
from jax.experimental import pallas as pl
from jax.experimental.pallas import tpu as pltpu

_LANE = 128
_SUBLANE = 8
_VMEM_LIMIT_BYTES = 32 * 1024 * 1024


def _block_budget_bytes():
    """Per-block streaming budget: ~2 MiB on v5e, ~4 MiB on v6e/v7x."""
    try:
        kind = jax.devices()[0].device_kind.lower()
    except Exception:
        kind = ""
    if "v5 lite" in kind or "v5e" in kind or "v5litepod" in kind:
        return 2 * 1024 * 1024
    return 4 * 1024 * 1024


def _pick_tiles(rows, bc, lanes, itemsize, budget, row_align=1):
    """Tile a (rows, bc, lanes) array for HBM streaming.

    lane_tile is the full lane extent or a multiple of 128; row_tile is the full
    row extent or a multiple of `row_align`.  One block is ~`budget` bytes.  If
    the whole array would fit a single block, the row axis is split so a
    "parallel" grid axis has >=2 points (keeps both v7x TensorCores busy).
    """
    bytes_per_lane = max(1, bc * itemsize)
    min_rows = max(_SUBLANE, row_align)
    lane_cap = max(_LANE, budget // (min_rows * bytes_per_lane))
    if lanes <= lane_cap:
        tl = lanes
    else:
        tl = (lane_cap // _LANE) * _LANE

    tr = max(1, budget // max(1, tl * bytes_per_lane))
    if tr >= rows:
        tr = rows
    elif row_align > 1:
        tr = max(row_align, (tr // row_align) * row_align)

    if tr >= rows and tl >= lanes:          # whole array in one block -> split rows
        half = pl.cdiv(rows, 2)
        if row_align > 1:
            half = row_align * pl.cdiv(half, row_align)
        if half < rows:
            tr = half
    return tr, tl


# ---------------------------------------------------------------------------
# K1: masked / GAP-weighted row sums over the spatial axis
#     out[r, c] = row_scale[r, 0] * sum_s x[r, c, s]
# ---------------------------------------------------------------------------
def _rowsum_kernel(x_ref, s_ref, o_ref, *, lanes, lane_tile, need_mask):
    @pl.when(pl.program_id(1) == 0)
    def _init():
        o_ref[...] = jnp.zeros_like(o_ref)

    x = x_ref[...].astype(jnp.float32)
    if need_mask:
        lane_idx = lax.broadcasted_iota(jnp.int32, x.shape, 2)
        valid = lane_idx + pl.program_id(1) * lane_tile < lanes
        x = jnp.where(valid, x, 0.0)
    o_ref[...] += s_ref[...] * jnp.sum(x, axis=2)


def _masked_row_sums(x3, row_scale, budget):
    rows, bc, lanes = x3.shape
    tr, ts = _pick_tiles(rows, bc, lanes, jnp.dtype(x3.dtype).itemsize,
                         budget, row_align=_SUBLANE)
    grid = (pl.cdiv(rows, tr), pl.cdiv(lanes, ts))
    kernel = functools.partial(_rowsum_kernel, lanes=lanes, lane_tile=ts,
                               need_mask=(lanes % ts) != 0)
    return pl.pallas_call(
        kernel,
        out_shape=jax.ShapeDtypeStruct((rows, bc), jnp.float32),
        grid=grid,
        in_specs=[
            pl.BlockSpec((tr, bc, ts), lambda i, j: (i, 0, j)),
            pl.BlockSpec((tr, 1), lambda i, j: (i, 0)),
        ],
        out_specs=pl.BlockSpec((tr, bc), lambda i, j: (i, 0)),
        compiler_params=pltpu.CompilerParams(
            dimension_semantics=("parallel", "arbitrary"),
            vmem_limit_bytes=_VMEM_LIMIT_BYTES),
    )(x3, row_scale)


# ---------------------------------------------------------------------------
# K2: attention head (tiny; single untiled block, no grid)
# ---------------------------------------------------------------------------
def _head_kernel(gap_ref, w1_ref, b1_ref, gamma_ref, beta_ref, wg_ref, bg_ref,
                 atten_ref, *, eps, lowest_atten):
    gap = gap_ref[...]                                                  # (N, BC)
    h = jnp.dot(gap, w1_ref[...], preferred_element_type=jnp.float32) + b1_ref[...]
    # BatchNorm1d with training-mode (batch) statistics, matching the training
    # forward that block dropout implies.
    mu = jnp.mean(h, axis=0, keepdims=True)
    var = jnp.mean((h - mu) ** 2, axis=0, keepdims=True)
    h = (h - mu) * lax.rsqrt(var + eps) * gamma_ref[...] + beta_ref[...]
    h = jnp.maximum(h, 0.0)                                             # ReLU
    # Per-block linears: (N, RC) x (TB, RC, BC) -> (N, TB, BC)
    logits = jnp.einsum("nr,krc->nkc", h, wg_ref[...],
                        preferred_element_type=jnp.float32) + bg_ref[...][None, :, :]
    # Softmax across the block axis.
    m = jnp.max(logits, axis=1, keepdims=True)
    e = jnp.exp(logits - m)
    sm = e / jnp.sum(e, axis=1, keepdims=True)
    atten_ref[...] = lowest_atten + sm * (1.0 - lowest_atten)


def _attention_head(gap, params, lowest_atten):
    n = gap.shape[0]
    tb, _, bc = params["wg"].shape
    return pl.pallas_call(
        functools.partial(_head_kernel, eps=1e-5, lowest_atten=float(lowest_atten)),
        out_shape=jax.ShapeDtypeStruct((n, tb, bc), jnp.float32),
    )(gap, params["w1"], params["b1"], params["gamma"], params["beta"],
      params["wg"], params["bg"])


# ---------------------------------------------------------------------------
# K3: broadcast multiply  out[r, c, s] = x[r, c, s] * scale[r, c]
# ---------------------------------------------------------------------------
def _scale_kernel(x_ref, s_ref, o_ref):
    o_ref[...] = (x_ref[...] * s_ref[...]).astype(o_ref.dtype)


def _apply_scale(x3, scale3, budget):
    rows, bc, lanes = x3.shape
    tr, tl = _pick_tiles(rows, bc, lanes, jnp.dtype(x3.dtype).itemsize,
                         budget, row_align=1)
    grid = (pl.cdiv(rows, tr), pl.cdiv(lanes, tl))
    return pl.pallas_call(
        _scale_kernel,
        out_shape=jax.ShapeDtypeStruct((rows, bc, lanes), x3.dtype),
        grid=grid,
        in_specs=[
            pl.BlockSpec((tr, bc, tl), lambda i, j: (i, 0, j)),
            pl.BlockSpec((tr, bc, 1), lambda i, j: (i, 0, 0)),
        ],
        out_specs=pl.BlockSpec((tr, bc, tl), lambda i, j: (i, 0, j)),
        compiler_params=pltpu.CompilerParams(
            dimension_semantics=("parallel", "parallel"),
            vmem_limit_bytes=_VMEM_LIMIT_BYTES),
    )(x3, scale3)


# ---------------------------------------------------------------------------
# Forward pass (jitted; cfg is a static closure)
# ---------------------------------------------------------------------------
def _msaf_forward(params, key, X, *, cfg):
    num_blocks = cfg["num_blocks"]
    bc = cfg["block_channel"]
    p = cfg["block_dropout_p"]
    lowest_atten = cfg["lowest_atten"]
    budget = cfg["block_budget"]
    n = X[0].shape[0]
    total_blocks = sum(num_blocks)

    # Channel-block reshape (zero-pad the channel axis up to nb*bc, slice back at
    # the end).
    reshaped, spatials = [], []
    for x, nb in zip(X, num_blocks):
        c = x.shape[1]
        pad_c = nb * bc - c
        if pad_c:
            x = jnp.pad(x, [(0, 0), (0, pad_c)] + [(0, 0)] * (x.ndim - 2))
        s = math.prod(x.shape[2:]) if x.ndim > 2 else 1
        reshaped.append(x.reshape(n * nb, bc, s))
        spatials.append(s)

    # Block-dropout mask (N, total_blocks): Bernoulli(1 - p) / (1 - p).
    if p is not None:
        keep = 1.0 - p
        mask = jax.random.bernoulli(key, keep, (n, total_blocks)).astype(jnp.float32) / keep
    else:
        mask = None

    # K1 (fused GAP weighting):
    #   gap[n, c] = sum_m sum_b (mask[n, b] / S_m) * sum_s x_m[n, b, c, s]
    gap = jnp.zeros((n, bc), jnp.float32)
    off = 0
    for x3, nb, s in zip(reshaped, num_blocks, spatials):
        if mask is not None:
            row_scale = (mask[:, off:off + nb] / s).reshape(n * nb, 1)
        else:
            row_scale = jnp.full((n * nb, 1), 1.0 / s, jnp.float32)
        rowsum = _masked_row_sums(x3, row_scale, budget)            # (n*nb, bc) f32
        gap = gap + rowsum.reshape(n, nb, bc).sum(axis=1)
        off += nb

    # K2: attention head -> (N, total_blocks, bc)
    atten = _attention_head(gap, params, lowest_atten)

    # K3: per-block scaling.  The original module multiplies the (already
    # dropout-scaled) tensors by the mask again in training -> mask^2 here
    # (intentional, matching the PyTorch module).
    outs = []
    off = 0
    for x3, x_orig, nb in zip(reshaped, X, num_blocks):
        a_m = atten[:, off:off + nb, :]                             # (N, nb, BC)
        if mask is not None:
            m_m = mask[:, off:off + nb]
            scale = a_m * (m_m * m_m)[:, :, None]
        else:
            scale = a_m
        scale3 = scale.reshape(n * nb, bc, 1).astype(x3.dtype)
        out3 = _apply_scale(x3, scale3, budget)                     # (n*nb, bc, s)
        c = x_orig.shape[1]
        out = out3.reshape((n, nb * bc) + x_orig.shape[2:])[:, :c]
        outs.append(out)
        off += nb
    return tuple(outs)


# ---------------------------------------------------------------------------
# Module-equivalent wrapper
# ---------------------------------------------------------------------------
class MSAFBlock:
    def __init__(self, key, in_channels, block_channel, block_dropout=0.0,
                 lowest_atten=0.0, reduction_factor=4):
        if block_dropout < 0.0 or block_dropout > 1.0:
            raise ValueError(
                "dropout probability has to be between 0 and 1, but got {}".format(block_dropout))
        self.in_channels = list(in_channels)
        self.block_channel = int(block_channel)
        self.lowest_atten = float(lowest_atten)
        self.num_modality = len(in_channels)
        self.reduced_channel = self.block_channel // reduction_factor
        self.num_blocks = [math.ceil(ic / self.block_channel) for ic in in_channels]
        self.last_block_padding = [ic % self.block_channel for ic in in_channels]
        p = float(block_dropout)
        self.block_dropout_p = p if 0.0 < p < 1.0 else None   # same gate as the original

        bc, rc = self.block_channel, self.reduced_channel
        tb = sum(self.num_blocks)
        k1, k2, k3, k4 = jax.random.split(key, 4)
        lim1 = 1.0 / math.sqrt(bc)
        limg = 1.0 / math.sqrt(max(rc, 1))
        self.params = {
            # Linear(block_channel -> reduced_channel), stored transposed.
            "w1": jax.random.uniform(k1, (bc, rc), jnp.float32, -lim1, lim1),
            "b1": jax.random.uniform(k2, (1, rc), jnp.float32, -lim1, lim1),
            # BatchNorm1d(reduced_channel) affine parameters.
            "gamma": jnp.ones((1, rc), jnp.float32),
            "beta": jnp.zeros((1, rc), jnp.float32),
            # One Linear(reduced_channel -> block_channel) per block, stacked.
            "wg": jax.random.uniform(k3, (tb, rc, bc), jnp.float32, -limg, limg),
            "bg": jax.random.uniform(k4, (tb, bc), jnp.float32, -limg, limg),
        }
        self._cfg = dict(
            num_blocks=tuple(self.num_blocks),
            block_channel=bc,
            block_dropout_p=self.block_dropout_p,
            lowest_atten=self.lowest_atten,
            block_budget=_block_budget_bytes(),
        )
        self._forward = jax.jit(functools.partial(_msaf_forward, cfg=self._cfg))

    def __call__(self, X, key=None):
        assert len(X) == self.num_modality
        n0 = X[0].shape[0]
        for x, ic in zip(X, self.in_channels):
            assert x.shape[1] == ic, (
                "X shape and in_channels are different. expected {} got {}".format(ic, x.shape[1]))
            assert x.shape[0] == n0, "all modalities must share the batch dimension"
        if key is None:
            key = jax.random.PRNGKey(0)
        return self._forward(self.params, key, tuple(X))


# ---------------------------------------------------------------------------
# Pure-JAX reference (mirrors the PyTorch forward op-for-op, with the channel
# padding done on the channel axis as intended)
# ---------------------------------------------------------------------------
def _reference_forward(params, cfg, key, X):
    num_blocks = cfg["num_blocks"]
    bc = cfg["block_channel"]
    p = cfg["block_dropout_p"]
    lowest = cfg["lowest_atten"]
    n = X[0].shape[0]
    tb = sum(num_blocks)

    padded = []
    for x, nb in zip(X, num_blocks):
        pad_c = nb * bc - x.shape[1]
        if pad_c:
            x = jnp.pad(x, [(0, 0), (0, pad_c)] + [(0, 0)] * (x.ndim - 2))
        padded.append(x)
    reshaped = [x.reshape((n, nb, bc) + x.shape[2:]) for x, nb in zip(padded, num_blocks)]

    masks = None
    if p is not None:
        keep = 1.0 - p
        mask = jax.random.bernoulli(key, keep, (n, tb)).astype(jnp.float32) / keep
        masks, off = [], 0
        for x, nb in zip(reshaped, num_blocks):
            masks.append(mask[:, off:off + nb].reshape((n, nb) + (1,) * (x.ndim - 2)))
            off += nb
        reshaped = [x * m for x, m in zip(reshaped, masks)]

    elem_sum = [jnp.sum(x, axis=1) for x in reshaped]
    gap = sum(es.reshape(n, bc, -1).mean(axis=-1) for es in elem_sum)

    h = gap @ params["w1"] + params["b1"]
    mu = h.mean(axis=0, keepdims=True)
    var = ((h - mu) ** 2).mean(axis=0, keepdims=True)
    h = (h - mu) * lax.rsqrt(var + 1e-5) * params["gamma"] + params["beta"]
    h = jnp.maximum(h, 0.0)

    logits = jnp.einsum("nr,krc->nkc", h, params["wg"]) + params["bg"][None, :, :]
    sm = jax.nn.softmax(logits, axis=1)
    atten = lowest + sm * (1.0 - lowest)

    outs, off = [], 0
    for i, (x, nb) in enumerate(zip(reshaped, num_blocks)):
        a = atten[:, off:off + nb, :].reshape((n, nb, bc) + (1,) * (x.ndim - 3))
        off += nb
        y = x * masks[i] * a if p is not None else x * a
        c = X[i].shape[1]
        y = y.reshape((n, nb * bc) + X[i].shape[2:])[:, :c]
        outs.append(y)
    return tuple(outs)


if __name__ == "__main__":
    root = jax.random.PRNGKey(0)
    k_param, k_x1, k_x2, k_x3, k_drop = jax.random.split(root, 5)

    in_channels = [32, 16]
    block_channel = 16

    # 1) training path with block dropout (mask applied twice, as in the original)
    msaf = MSAFBlock(k_param, in_channels, block_channel,
                     block_dropout=0.3, lowest_atten=0.1, reduction_factor=4)
    x1 = jax.random.normal(k_x1, (2, 32, 16, 16), jnp.float32)   # (N, C, H, W)
    x2 = jax.random.normal(k_x2, (2, 16, 128), jnp.float32)      # (N, C, L)
    X = (x1, x2)
    outs = jax.block_until_ready(msaf(X, key=k_drop))
    refs = _reference_forward(msaf.params, msaf._cfg, k_drop, X)
    for o, r in zip(outs, refs):
        assert o.shape == r.shape and o.dtype == r.dtype
        assert jnp.allclose(o, r, rtol=1e-3, atol=1e-3), float(jnp.max(jnp.abs(o - r)))

    # 2) no-dropout path
    msaf_nd = MSAFBlock(k_param, in_channels, block_channel,
                        block_dropout=0.0, lowest_atten=0.0, reduction_factor=4)
    outs_nd = jax.block_until_ready(msaf_nd(X))
    refs_nd = _reference_forward(msaf_nd.params, msaf_nd._cfg, jax.random.PRNGKey(1), X)
    for o, r in zip(outs_nd, refs_nd):
        assert jnp.allclose(o, r, rtol=1e-3, atol=1e-3), float(jnp.max(jnp.abs(o - r)))

    # 3) channels not divisible by block_channel (intended zero-pad semantics; the
    #    original PyTorch module would crash on this input).
    msaf_odd = MSAFBlock(k_param, [20], block_channel,
                         block_dropout=0.25, lowest_atten=0.05, reduction_factor=4)
    x3 = jax.random.normal(k_x3, (2, 20, 8, 8), jnp.float32)
    outs_odd = jax.block_until_ready(msaf_odd((x3,), key=k_drop))
    refs_odd = _reference_forward(msaf_odd.params, msaf_odd._cfg, k_drop, (x3,))
    for o, r in zip(outs_odd, refs_odd):
        assert o.shape == r.shape
        assert jnp.allclose(o, r, rtol=1e-3, atol=1e-3), float(jnp.max(jnp.abs(o - r)))

    print("KERNEL_OK")
</pallas_src>

<mosaic_0001>
module attributes {stable_mosaic.version = 11 : i64} {
  func.func @_rowsum_kernel(%arg0: i32, %arg1: i32, %arg2: memref<2x16x128xf32, #tpu.memory_space<vmem>>, %arg3: memref<2x1xf32, #tpu.memory_space<vmem>>, %arg4: memref<2x16xf32, #tpu.memory_space<vmem>>) attributes {dimension_semantics = [#tpu.dimension_semantics<parallel>, #tpu.dimension_semantics<arbitrary>], iteration_bounds = array<i64: 1, 1>, scalar_prefetch = 0 : i64, scratch_operands = 0 : i64, tpu.core_type = #tpu.core_type<tc>, window_params = [{transform_indices = @transform_0, window_bounds = array<i64: 2, 16, 128>}, {transform_indices = @transform_1, window_bounds = array<i64: 2, 1>}, {transform_indices = @transform_2, window_bounds = array<i64: 2, 16>}]} {
    %c0_i32 = arith.constant 0 : i32
    %0 = arith.cmpi eq, %arg1, %c0_i32 : i32
    %1 = arith.extui %0 : i1 to i32
    %c0_i32_0 = arith.constant 0 : i32
    %2 = arith.cmpi ne, %1, %c0_i32_0 : i32
    scf.if %2 {
      %cst_9 = arith.constant 0.000000e+00 : f32
      %11 = vector.broadcast %cst_9 : f32 to vector<2x16xf32>
      %c0_10 = arith.constant 0 : index
      %c0_11 = arith.constant 0 : index
      %12 = vector.load %arg4[%c0_10, %c0_11] : memref<2x16xf32, #tpu.memory_space<vmem>>, vector<2x16xf32>
      tpu.vector_store %arg4[%c0_10, %c0_11], %11 {strides = array<i32>} : memref<2x16xf32, #tpu.memory_space<vmem>>, vector<2x16xf32>,
    } else {
    }
    %c0 = arith.constant 0 : index
    %c0_1 = arith.constant 0 : index
    %c0_2 = arith.constant 0 : index
    %3 = vector.load %arg2[%c0, %c0_1, %c0_2] : memref<2x16x128xf32, #tpu.memory_space<vmem>>, vector<2x16x128xf32>
    %c0_3 = arith.constant 0 : index
    %c0_4 = arith.constant 0 : index
    %4 = vector.load %arg4[%c0_3, %c0_4] : memref<2x16xf32, #tpu.memory_space<vmem>>, vector<2x16xf32>
    %c0_5 = arith.constant 0 : index
    %c0_6 = arith.constant 0 : index
    %5 = vector.load %arg3[%c0_5, %c0_6] : memref<2x1xf32, #tpu.memory_space<vmem>>, vector<2x1xf32>
    %cst = arith.constant dense<0.000000e+00> : vector<2x16xf32>
    %6 = vector.multi_reduction <add>, %3, %cst [2] : vector<2x16x128xf32> to vector<2x16xf32>
    %7 = vector.broadcast %5 : vector<2x1xf32> to vector<2x16xf32>
    %8 = arith.mulf %7, %6 : vector<2x16xf32>
    %9 = arith.addf %4, %8 : vector<2x16xf32>
    %c0_7 = arith.constant 0 : index
    %c0_8 = arith.constant 0 : index
    %10 = vector.load %arg4[%c0_7, %c0_8] : memref<2x16xf32, #tpu.memory_space<vmem>>, vector<2x16xf32>
    tpu.vector_store %arg4[%c0_7, %c0_8], %9 {strides = array<i32>} : memref<2x16xf32, #tpu.memory_space<vmem>>, vector<2x16xf32>,
    return
  }
  func.func @transform_0(%arg0: i32, %arg1: i32) -> (i32, i32, i32) {
    %c0_i32 = arith.constant 0 : i32
    %c0_i32_0 = arith.constant 0 : i32
    return %arg0, %c0_i32, %arg1 : i32, i32, i32
  }
  func.func @transform_1(%arg0: i32, %arg1: i32) -> (i32, i32) {
    %c0_i32 = arith.constant 0 : i32
    %c0_i32_0 = arith.constant 0 : i32
    return %arg0, %c0_i32 : i32, i32
  }
  func.func @transform_2(%arg0: i32, %arg1: i32) -> (i32, i32) {
    %c0_i32 = arith.constant 0 : i32
    %c0_i32_0 = arith.constant 0 : i32
    return %arg0, %c0_i32 : i32, i32
  }
}

module attributes {stable_mosaic.version = 11 : i64} {
  func.func @_rowsum_kernel(%arg0: i32, %arg1: i32, %arg2: memref<4x16x256xf32, #tpu.memory_space<vmem>>, %arg3: memref<4x1xf32, #tpu.memory_space<vmem>>, %arg4: memref<4x16xf32, #tpu.memory_space<vmem>>) attributes {dimension_semantics = [#tpu.dimension_semantics<parallel>, #tpu.dimension_semantics<arbitrary>], iteration_bounds = array<i64: 1, 1>, scalar_prefetch = 0 : i64, scratch_operands = 0 : i64, tpu.core_type = #tpu.core_type<tc>, window_params = [{transform_indices = @transform_0, window_bounds = array<i64: 4, 16, 256>}, {transform_indices = @transform_1, window_bounds = array<i64: 4, 1>}, {transform_indices = @transform_2, window_bounds = array<i64: 4, 16>}]} {
    %c0_i32 = arith.constant 0 : i32
    %0 = arith.cmpi eq, %arg1, %c0_i32 : i32
    %1 = arith.extui %0 : i1 to i32
    %c0_i32_0 = arith.constant 0 : i32
    %2 = arith.cmpi ne, %1, %c0_i32_0 : i32
    scf.if %2 {
      %cst_9 = arith.constant 0.000000e+00 : f32
      %11 = vector.broadcast %cst_9 : f32 to vector<4x16xf32>
      %c0_10 = arith.constant 0 : index
      %c0_11 = arith.constant 0 : index
      %12 = vector.load %arg4[%c0_10, %c0_11] : memref<4x16xf32, #tpu.memory_space<vmem>>, vector<4x16xf32>
      tpu.vector_store %arg4[%c0_10, %c0_11], %11 {strides = array<i32>} : memref<4x16xf32, #tpu.memory_space<vmem>>, vector<4x16xf32>,
    } else {
    }
    %c0 = arith.constant 0 : index
    %c0_1 = arith.constant 0 : index
    %c0_2 = arith.constant 0 : index
    %3 = vector.load %arg2[%c0, %c0_1, %c0_2] : memref<4x16x256xf32, #tpu.memory_space<vmem>>, vector<4x16x256xf32>
    %c0_3 = arith.constant 0 : index
    %c0_4 = arith.constant 0 : index
    %4 = vector.load %arg4[%c0_3, %c0_4] : memref<4x16xf32, #tpu.memory_space<vmem>>, vector<4x16xf32>
    %c0_5 = arith.constant 0 : index
    %c0_6 = arith.constant 0 : index
    %5 = vector.load %arg3[%c0_5, %c0_6] : memref<4x1xf32, #tpu.memory_space<vmem>>, vector<4x1xf32>
    %cst = arith.constant dense<0.000000e+00> : vector<4x16xf32>
    %6 = vector.multi_reduction <add>, %3, %cst [2] : vector<4x16x256xf32> to vector<4x16xf32>
    %7 = vector.broadcast %5 : vector<4x1xf32> to vector<4x16xf32>
    %8 = arith.mulf %7, %6 : vector<4x16xf32>
    %9 = arith.addf %4, %8 : vector<4x16xf32>
    %c0_7 = arith.constant 0 : index
    %c0_8 = arith.constant 0 : index
    %10 = vector.load %arg4[%c0_7, %c0_8] : memref<4x16xf32, #tpu.memory_space<vmem>>, vector<4x16xf32>
    tpu.vector_store %arg4[%c0_7, %c0_8], %9 {strides = array<i32>} : memref<4x16xf32, #tpu.memory_space<vmem>>, vector<4x16xf32>,
    return
  }
  func.func @transform_0(%arg0: i32, %arg1: i32) -> (i32, i32, i32) {
    %c0_i32 = arith.constant 0 : i32
    %c0_i32_0 = arith.constant 0 : i32
    return %arg0, %c0_i32, %arg1 : i32, i32, i32
  }
  func.func @transform_1(%arg0: i32, %arg1: i32) -> (i32, i32) {
    %c0_i32 = arith.constant 0 : i32
    %c0_i32_0 = arith.constant 0 : i32
    return %arg0, %c0_i32 : i32, i32
  }
  func.func @transform_2(%arg0: i32, %arg1: i32) -> (i32, i32) {
    %c0_i32 = arith.constant 0 : i32
    %c0_i32_0 = arith.constant 0 : i32
    return %arg0, %c0_i32 : i32, i32
  }
}

module attributes {stable_mosaic.version = 11 : i64} {
  func.func @_head_kernel(%arg0: memref<2x16xf32, #tpu.memory_space<vmem>>, %arg1: memref<16x4xf32, #tpu.memory_space<vmem>>, %arg2: memref<1x4xf32, #tpu.memory_space<vmem>>, %arg3: memref<1x4xf32, #tpu.memory_space<vmem>>, %arg4: memref<1x4xf32, #tpu.memory_space<vmem>>, %arg5: memref<3x4x16xf32, #tpu.memory_space<vmem>>, %arg6: memref<3x16xf32, #tpu.memory_space<vmem>>, %arg7: memref<2x3x16xf32, #tpu.memory_space<vmem>>) attributes {dimension_semantics = [], scalar_prefetch = 0 : i64, scratch_operands = 0 : i64, tpu.core_type = #tpu.core_type<tc>} {
    %c0 = arith.constant 0 : index
    %c0_0 = arith.constant 0 : index
    %0 = vector.load %arg0[%c0, %c0_0] : memref<2x16xf32, #tpu.memory_space<vmem>>, vector<2x16xf32>
    %c0_1 = arith.constant 0 : index
    %c0_2 = arith.constant 0 : index
    %1 = vector.load %arg1[%c0_1, %c0_2] : memref<16x4xf32, #tpu.memory_space<vmem>>, vector<16x4xf32>
    %cst = arith.constant dense<0.000000e+00> : vector<2x4xf32>
    %2 = tpu.matmul %0, %1, %cst {dimension_numbers = #tpu.dot_dimension_numbers<[1], [0], [0], [1], [0, 0, 1, 1], [], []>} : vector<2x16xf32>, vector<16x4xf32>, vector<2x4xf32> -> vector<2x4xf32>
    %c0_3 = arith.constant 0 : index
    %c0_4 = arith.constant 0 : index
    %3 = vector.load %arg2[%c0_3, %c0_4] : memref<1x4xf32, #tpu.memory_space<vmem>>, vector<1x4xf32>
    %4 = vector.broadcast %3 : vector<1x4xf32> to vector<2x4xf32>
    %5 = arith.addf %2, %4 : vector<2x4xf32>
    %cst_5 = arith.constant dense<0.000000e+00> : vector<4xf32>
    %6 = vector.multi_reduction <add>, %5, %cst_5 [0] : vector<2x4xf32> to vector<4xf32>
    %7 = vector.shape_cast %6 : vector<4xf32> to vector<1x4xf32>
    %cst_6 = arith.constant 2.000000e+00 : f32
    %8 = vector.broadcast %cst_6 : f32 to vector<1x4xf32>
    %9 = arith.divf %7, %8 : vector<1x4xf32>
    %10 = vector.broadcast %9 : vector<1x4xf32> to vector<2x4xf32>
    %11 = arith.subf %5, %10 : vector<2x4xf32>
    %12 = arith.mulf %11, %11 : vector<2x4xf32>
    %cst_7 = arith.constant dense<0.000000e+00> : vector<4xf32>
    %13 = vector.multi_reduction <add>, %12, %cst_7 [0] : vector<2x4xf32> to vector<4xf32>
    %14 = vector.shape_cast %13 : vector<4xf32> to vector<1x4xf32>
    %cst_8 = arith.constant 2.000000e+00 : f32
    %15 = vector.broadcast %cst_8 : f32 to vector<1x4xf32>
    %16 = arith.divf %14, %15 : vector<1x4xf32>
    %17 = vector.broadcast %9 : vector<1x4xf32> to vector<2x4xf32>
    %18 = arith.subf %5, %17 : vector<2x4xf32>
    %cst_9 = arith.constant 9.99999974E-6 : f32
    %19 = vector.broadcast %cst_9 : f32 to vector<1x4xf32>
    %20 = arith.addf %16, %19 : vector<1x4xf32>
    %21 = math.rsqrt %20 : vector<1x4xf32>
    %22 = vector.broadcast %21 : vector<1x4xf32> to vector<2x4xf32>
    %23 = arith.mulf %18, %22 : vector<2x4xf32>
    %c0_10 = arith.constant 0 : index
    %c0_11 = arith.constant 0 : index
    %24 = vector.load %arg3[%c0_10, %c0_11] : memref<1x4xf32, #tpu.memory_space<vmem>>, vector<1x4xf32>
    %25 = vector.broadcast %24 : vector<1x4xf32> to vector<2x4xf32>
    %26 = arith.mulf %23, %25 : vector<2x4xf32>
    %c0_12 = arith.constant 0 : index
    %c0_13 = arith.constant 0 : index
    %27 = vector.load %arg4[%c0_12, %c0_13] : memref<1x4xf32, #tpu.memory_space<vmem>>, vector<1x4xf32>
    %28 = vector.broadcast %27 : vector<1x4xf32> to vector<2x4xf32>
    %29 = arith.addf %26, %28 : vector<2x4xf32>
    %cst_14 = arith.constant 0.000000e+00 : f32
    %30 = vector.broadcast %cst_14 : f32 to vector<2x4xf32>
    %31 = arith.maximumf %29, %30 : vector<2x4xf32>
    %c0_15 = arith.constant 0 : index
    %c0_16 = arith.constant 0 : index
    %c0_17 = arith.constant 0 : index
    %32 = vector.load %arg5[%c0_15, %c0_16, %c0_17] : memref<3x4x16xf32, #tpu.memory_space<vmem>>, vector<3x4x16xf32>
    "tpu.trace_start"() <{level = 10 : i32, message = "nr,krc->nkc"}> : () -> ()
    %cst_18 = arith.constant dense<0.000000e+00> : vector<2x3x16xf32>
    %33 = tpu.matmul %31, %32, %cst_18 {dimension_numbers = #tpu.dot_dimension_numbers<[1], [1], [0], [0, 2], [0, 0, 1, 0, 1, 2], [], []>} : vector<2x4xf32>, vector<3x4x16xf32>, vector<2x3x16xf32> -> vector<2x3x16xf32>
    "tpu.trace_stop"() : () -> ()
    %c0_19 = arith.constant 0 : index
    %c0_20 = arith.constant 0 : index
    %34 = vector.load %arg6[%c0_19, %c0_20] : memref<3x16xf32, #tpu.memory_space<vmem>>, vector<3x16xf32>
    %35 = vector.shape_cast %34 : vector<3x16xf32> to vector<1x3x16xf32>
    %36 = vector.broadcast %35 : vector<1x3x16xf32> to vector<2x3x16xf32>
    %37 = arith.addf %33, %36 : vector<2x3x16xf32>
    %cst_21 = arith.constant dense<0xFF800000> : vector<2x16xf32>
    %38 = vector.multi_reduction <maximumf>, %37, %cst_21 [1] : vector<2x3x16xf32> to vector<2x16xf32>
    %39 = vector.shape_cast %38 : vector<2x16xf32> to vector<2x1x16xf32>
    %40 = vector.broadcast %39 : vector<2x1x16xf32> to vector<2x3x16xf32>
    %41 = arith.subf %37, %40 : vector<2x3x16xf32>
    %42 = math.exp %41 : vector<2x3x16xf32>
    %cst_22 = arith.constant dense<0.000000e+00> : vector<2x16xf32>
    %43 = vector.multi_reduction <add>, %42, %cst_22 [1] : vector<2x3x16xf32> to vector<2x16xf32>
    %44 = vector.shape_cast %43 : vector<2x16xf32> to vector<2x1x16xf32>
    %45 = vector.broadcast %44 : vector<2x1x16xf32> to vector<2x3x16xf32>
    %46 = arith.divf %42, %45 : vector<2x3x16xf32>
    %cst_23 = arith.constant 0.899999976 : f32
    %47 = vector.broadcast %cst_23 : f32 to vector<2x3x16xf32>
    %48 = arith.mulf %46, %47 : vector<2x3x16xf32>
    %cst_24 = arith.constant 1.000000e-01 : f32
    %49 = vector.broadcast %cst_24 : f32 to vector<2x3x16xf32>
    %50 = arith.addf %49, %48 : vector<2x3x16xf32>
    %c0_25 = arith.constant 0 : index
    %c0_26 = arith.constant 0 : index
    %c0_27 = arith.constant 0 : index
    %51 = vector.load %arg7[%c0_25, %c0_26, %c0_27] : memref<2x3x16xf32, #tpu.memory_space<vmem>>, vector<2x3x16xf32>
    tpu.vector_store %arg7[%c0_25, %c0_26, %c0_27], %50 {strides = array<i32>} : memref<2x3x16xf32, #tpu.memory_space<vmem>>, vector<2x3x16xf32>,
    return
  }
}

module attributes {stable_mosaic.version = 11 : i64} {
  func.func @_scale_kernel(%arg0: i32, %arg1: i32, %arg2: memref<2x16x256xf32, #tpu.memory_space<vmem>>, %arg3: memref<2x16x1xf32, #tpu.memory_space<vmem>>, %arg4: memref<2x16x256xf32, #tpu.memory_space<vmem>>) attributes {dimension_semantics = [#tpu.dimension_semantics<parallel>, #tpu.dimension_semantics<parallel>], iteration_bounds = array<i64: 2, 1>, scalar_prefetch = 0 : i64, scratch_operands = 0 : i64, tpu.core_type = #tpu.core_type<tc>, window_params = [{transform_indices = @transform_0, window_bounds = array<i64: 2, 16, 256>}, {transform_indices = @transform_1, window_bounds = array<i64: 2, 16, 1>}, {transform_indices = @transform_2, window_bounds = array<i64: 2, 16, 256>}]} {
    %c0 = arith.constant 0 : index
    %c0_0 = arith.constant 0 : index
    %c0_1 = arith.constant 0 : index
    %0 = vector.load %arg2[%c0, %c0_0, %c0_1] : memref<2x16x256xf32, #tpu.memory_space<vmem>>, vector<2x16x256xf32>
    %c0_2 = arith.constant 0 : index
    %c0_3 = arith.constant 0 : index
    %c0_4 = arith.constant 0 : index
    %1 = vector.load %arg3[%c0_2, %c0_3, %c0_4] : memref<2x16x1xf32, #tpu.memory_space<vmem>>, vector<2x16x1xf32>
    %2 = vector.broadcast %1 : vector<2x16x1xf32> to vector<2x16x256xf32>
    %3 = arith.mulf %0, %2 : vector<2x16x256xf32>
    %c0_5 = arith.constant 0 : index
    %c0_6 = arith.constant 0 : index
    %c0_7 = arith.constant 0 : index
    %4 = vector.load %arg4[%c0_5, %c0_6, %c0_7] : memref<2x16x256xf32, #tpu.memory_space<vmem>>, vector<2x16x256xf32>
    tpu.vector_store %arg4[%c0_5, %c0_6, %c0_7], %3 {strides = array<i32>} : memref<2x16x256xf32, #tpu.memory_space<vmem>>, vector<2x16x256xf32>,
    return
  }
  func.func @transform_0(%arg0: i32, %arg1: i32) -> (i32, i32, i32) {
    %c0_i32 = arith.constant 0 : i32
    %c0_i32_0 = arith.constant 0 : i32
    return %arg0, %c0_i32, %arg1 : i32, i32, i32
  }
  func.func @transform_1(%arg0: i32, %arg1: i32) -> (i32, i32, i32) {
    %c0_i32 = arith.constant 0 : i32
    %c0_i32_0 = arith.constant 0 : i32
    %c0_i32_1 = arith.constant 0 : i32
    return %arg0, %c0_i32, %c0_i32_0 : i32, i32, i32
  }
  func.func @transform_2(%arg0: i32, %arg1: i32) -> (i32, i32, i32) {
    %c0_i32 = arith.constant 0 : i32
    %c0_i32_0 = arith.constant 0 : i32
    return %arg0, %c0_i32, %arg1 : i32, i32, i32
  }
}

module attributes {stable_mosaic.version = 11 : i64} {
  func.func @_scale_kernel(%arg0: i32, %arg1: i32, %arg2: memref<1x16x128xf32, #tpu.memory_space<vmem>>, %arg3: memref<1x16x1xf32, #tpu.memory_space<vmem>>, %arg4: memref<1x16x128xf32, #tpu.memory_space<vmem>>) attributes {dimension_semantics = [#tpu.dimension_semantics<parallel>, #tpu.dimension_semantics<parallel>], iteration_bounds = array<i64: 2, 1>, scalar_prefetch = 0 : i64, scratch_operands = 0 : i64, tpu.core_type = #tpu.core_type<tc>, window_params = [{transform_indices = @transform_0, window_bounds = array<i64: 1, 16, 128>}, {transform_indices = @transform_1, window_bounds = array<i64: 1, 16, 1>}, {transform_indices = @transform_2, window_bounds = array<i64: 1, 16, 128>}]} {
    %c0 = arith.constant 0 : index
    %c0_0 = arith.constant 0 : index
    %c0_1 = arith.constant 0 : index
    %0 = vector.load %arg2[%c0, %c0_0, %c0_1] : memref<1x16x128xf32, #tpu.memory_space<vmem>>, vector<1x16x128xf32>
    %c0_2 = arith.constant 0 : index
    %c0_3 = arith.constant 0 : index
    %c0_4 = arith.constant 0 : index
    %1 = vector.load %arg3[%c0_2, %c0_3, %c0_4] : memref<1x16x1xf32, #tpu.memory_space<vmem>>, vector<1x16x1xf32>
    %2 = vector.broadcast %1 : vector<1x16x1xf32> to vector<1x16x128xf32>
    %3 = arith.mulf %0, %2 : vector<1x16x128xf32>
    %c0_5 = arith.constant 0 : index
    %c0_6 = arith.constant 0 : index
    %c0_7 = arith.constant 0 : index
    %4 = vector.load %arg4[%c0_5, %c0_6, %c0_7] : memref<1x16x128xf32, #tpu.memory_space<vmem>>, vector<1x16x128xf32>
    tpu.vector_store %arg4[%c0_5, %c0_6, %c0_7], %3 {strides = array<i32>} : memref<1x16x128xf32, #tpu.memory_space<vmem>>, vector<1x16x128xf32>,
    return
  }
  func.func @transform_0(%arg0: i32, %arg1: i32) -> (i32, i32, i32) {
    %c0_i32 = arith.constant 0 : i32
    %c0_i32_0 = arith.constant 0 : i32
    return %arg0, %c0_i32, %arg1 : i32, i32, i32
  }
  func.func @transform_1(%arg0: i32, %arg1: i32) -> (i32, i32, i32) {
    %c0_i32 = arith.constant 0 : i32
    %c0_i32_0 = arith.constant 0 : i32
    %c0_i32_1 = arith.constant 0 : i32
    return %arg0, %c0_i32, %c0_i32_0 : i32, i32, i32
  }
  func.func @transform_2(%arg0: i32, %arg1: i32) -> (i32, i32, i32) {
    %c0_i32 = arith.constant 0 : i32
    %c0_i32_0 = arith.constant 0 : i32
    return %arg0, %c0_i32, %arg1 : i32, i32, i32
  }
}

</mosaic_0001>

<bundles_post_ra>
// kernel: _msaf_forward.6
= control target key start
LH: loop header
LB: loop body
LE: loop exit
PB: predicated region body
PF: predicated region fallthrough
CT: control target
= control target key end

     0   :  { %v76_v2 = vmov 0   ;;  %vm15_vm0 = vcmask 123904   ;;  %v77_v5 = vmov 0.0   ;;  %v40_v7 = vlaneseq  ;;  %s119_s0 = inlined_call_operand.vmem [shape: f32[2,16,128], index: 0, kind: input, shape index: {}]   ;;  %s120_s2 = inlined_call_operand.vmem [shape: f32[2,16], index: 2, kind: output, shape index: {}]   ;;  %s121_s1 = inlined_call_operand.vmem [shape: f32[2,1], index: 1, kind: input, shape index: {}]  }
   0x1   :  { %v19_v0 = vld [vmem:[%s119_s0 + $0x10] sm:$0xff]  ;;  %v17_v1 = vld [vmem:[%s119_s0] sm:$0xff]  ;;  %75 = vset.pattern.permute.xlu0 %v76_v2  ;;  %v20_v3 = vld [vmem:[%s119_s0 + $0x18] sm:$0xff]  ;;  %16 = vst.msk [vmem:[%s120_s2] sm:$0x3] %vm15_vm0, %v77_v5  ;;  %vm51_vm1 = vcmask 130112  }
   0x2   :  { %27 = vadd.xlane.f32.xlu1 %v19_v0  ;;  %23 = vadd.xlane.f32.xlu0 %v17_v1  ;;  %v18_v4 = vld [vmem:[%s119_s0 + $0x8] sm:$0xff]  ;;  %v22_v6 = vld [vmem:[%s121_s1] sm:$0x3]  ;;  %v41_v8 = vand.u32 127, %v40_v7  ;;  %v43_v10 = vshrl.u32 %v40_v7, 7  ;;  %vm62_vm2 = vcmask 1041409  }
   0x4   :  { %v46_v9 = vadd.s32 4294967288, %v41_v8  ;;  %v44_v14 = vsub.s32 %v41_v8, %v43_v10 }
   0x6   :  { %29 = vadd.xlane.f32.xlu1 %v20_v3  ;;  %25 = vadd.xlane.f32.xlu0 %v18_v4  ;;  %v49_v13 = vsub.s32 %v46_v9, %v43_v10 }
   0x8   :  { %v21_v23 = vld [vmem:[%s120_s2] sm:$0x3] }
  0x1c   :  { %33 = vperm.xlu0 %75, %v22_v6  }
  0x8f   :  { %v28_v11 = vpop.xlane.xlu1 %27  ;;  %v24_v12 = vpop.xlane.xlu0 %23 }
  0x90   :  { %v56_v17 = vrot.slane %v28_v11, %v44_v14  ;;  %v45_v20 = vrot.slane %v24_v12, %v44_v14 }
  0x93   :  { %v30_v15 = vpop.xlane.xlu1 %29  ;;  %v26_v16 = vpop.xlane.xlu0 %25 }
  0x94   :  { %v60_v18 = vrot.slane %v30_v15, %v49_v13  ;;  %v50_v19 = vrot.slane %v26_v16, %v49_v13 }
  0x96   :  { %v52_v21 = vsel %vm51_vm1, %v50_v19, %v45_v20  ;;  %v61_v22 = vsel %vm51_vm1, %v60_v18, %v56_v17 }
  0x97   :  { %v63_v24 = vsel %vm62_vm2, %v61_v22, %v52_v21 }
  0x9b   :  { %v34_v25 = vpop.permute.xlu0 %33 }
  0x9c   :  { %v65_v26 = vmul.f32 %v63_v24, %v34_v25 }
  0x9e   :  { %v66_v27 = vadd.f32 %v65_v26, %v21_v23 }
  0xa0   :  { %68 = vst.msk [vmem:[%s120_s2] sm:$0x3] %vm15_vm0, %v66_v27 }

// kernel: _msaf_forward.5
= control target key start
LH: loop header
LB: loop body
LE: loop exit
PB: predicated region body
PF: predicated region fallthrough
CT: control target
= control target key end

     0   :  { %v130_v3 = vmov 0   ;;  %vm15_vm0 = vcmask 125952   ;;  %v131_v25 = vmov 0.0   ;;  %v72_v27 = vlaneseq  ;;  %s209_s0 = inlined_call_operand.vmem [shape: f32[4,16,256], index: 0, kind: input, shape index: {}]   ;;  %s210_s2 = inlined_call_operand.vmem [shape: f32[4,16], index: 2, kind: output, shape index: {}]   ;;  %s211_s1 = inlined_call_operand.vmem [shape: f32[4,1], index: 1, kind: input, shape index: {}]  }
   0x1   :  { %v21_v0 = vld [vmem:[%s209_s0 + $0x20] sm:$0xff]  ;;  %v22_v1 = vld [vmem:[%s209_s0 + $0x28] sm:$0xff]  ;;  %129 = vset.pattern.permute.xlu0 %v130_v3  ;;  %v23_v6 = vld [vmem:[%s209_s0 + $0x30] sm:$0xff]  ;;  %16 = vst.msk [vmem:[%s210_s2] sm:$0xf] %vm15_vm0, %v131_v25  ;;  %vm83_vm1 = vcmask 130112  }
   0x2   :  { %v17_v2 = vld [vmem:[%s209_s0] sm:$0xff]  ;;  %v41_v4 = vadd.f32 %v22_v1, %v21_v0  ;;  %v18_v5 = vld [vmem:[%s209_s0 + $0x8] sm:$0xff]  ;;  %v24_v7 = vld [vmem:[%s209_s0 + $0x38] sm:$0xff]  ;;  %v73_v30 = vand.u32 127, %v72_v27  ;;  %v75_v34 = vshrl.u32 %v72_v27, 7  ;;  %vm112_vm2 = vcmask 1041409  }
   0x3   :  { %v35_v8 = vadd.f32 %v18_v5, %v17_v2  ;;  %v19_v9 = vld [vmem:[%s209_s0 + $0x10] sm:$0xff]  ;;  %v20_v10 = vld [vmem:[%s209_s0 + $0x18] sm:$0xff]  ;;  %v44_v11 = vadd.f32 %v24_v7, %v23_v6  ;;  %v25_v15 = vld [vmem:[%s209_s0 + $0x40] sm:$0xff]  ;;  %vm114_vm3 = vcmask 1042434   ;;  %vm116_vm4 = vcmask 1043459  }
   0x4   :  { %42 = vadd.xlane.f32.xlu1 %v41_v4  ;;  %v38_v12 = vadd.f32 %v20_v10, %v19_v9  ;;  %v27_v13 = vld [vmem:[%s209_s0 + $0x50] sm:$0xff]  ;;  %v28_v14 = vld [vmem:[%s209_s0 + $0x58] sm:$0xff]  ;;  %v26_v16 = vld [vmem:[%s209_s0 + $0x48] sm:$0xff]  ;;  %v78_v31 = vadd.s32 4294967288, %v73_v30  ;;  %v76_v38 = vsub.s32 %v73_v30, %v75_v34 }
   0x5   :  { %36 = vadd.xlane.f32.xlu0 %v35_v8  ;;  %v50_v17 = vadd.f32 %v28_v14, %v27_v13  ;;  %v47_v18 = vadd.f32 %v26_v16, %v25_v15  ;;  %v31_v19 = vld [vmem:[%s209_s0 + $0x70] sm:$0xff]  ;;  %v32_v20 = vld [vmem:[%s209_s0 + $0x78] sm:$0xff]  ;;  %v29_v21 = vld [vmem:[%s209_s0 + $0x60] sm:$0xff] }
   0x6   :  { %v30_v22 = vld [vmem:[%s209_s0 + $0x68] sm:$0xff]  ;;  %v56_v23 = vadd.f32 %v32_v20, %v31_v19  ;;  %v34_v26 = vld [vmem:[%s211_s1] sm:$0xf]  ;;  %v81_v35 = vsub.s32 %v78_v31, %v75_v34 }
   0x7   :  { %v53_v24 = vadd.f32 %v30_v22, %v29_v21 }
   0x8   :  { %45 = vadd.xlane.f32.xlu1 %v44_v11  ;;  %v33_v55 = vld [vmem:[%s210_s2] sm:$0xf] }
   0x9   :  { %39 = vadd.xlane.f32.xlu0 %v38_v12 }
   0xc   :  { %51 = vadd.xlane.f32.xlu1 %v50_v17 }
   0xd   :  { %48 = vadd.xlane.f32.xlu0 %v47_v18 }
  0x10   :  { %57 = vadd.xlane.f32.xlu1 %v56_v23 }
  0x11   :  { %54 = vadd.xlane.f32.xlu0 %v53_v24 }
  0x27   :  { %61 = vperm.xlu0 %129, %v34_v26  }
  0x91   :  { %v43_v28 = vpop.xlane.xlu1 %42 }
  0x92   :  { %v37_v29 = vpop.xlane.xlu0 %36  ;;  %v88_v39 = vrot.slane %v43_v28, %v76_v38 }
  0x93   :  { %v77_v46 = vrot.slane %v37_v29, %v76_v38 }
  0x95   :  { %v46_v32 = vpop.xlane.xlu1 %45 }
  0x96   :  { %v40_v33 = vpop.xlane.xlu0 %39  ;;  %v92_v40 = vrot.slane %v46_v32, %v81_v35 }
  0x97   :  { %v82_v41 = vrot.slane %v40_v33, %v81_v35 }
  0x98   :  { %v93_v49 = vsel %vm83_vm1, %v92_v40, %v88_v39 }
  0x99   :  { %v52_v36 = vpop.xlane.xlu1 %51  ;;  %v84_v50 = vsel %vm83_vm1, %v82_v41, %v77_v46 }
  0x9a   :  { %v49_v37 = vpop.xlane.xlu0 %48  ;;  %v101_v43 = vrot.slane %v52_v36, %v81_v35  ;;  %v113_v53 = vsel %vm112_vm2, %v93_v49, %v84_v50 }
  0x9b   :  { %v97_v44 = vrot.slane %v49_v37, %v76_v38 }
  0x9d   :  { %v58_v42 = vpop.xlane.xlu1 %57  ;;  %v102_v51 = vsel %vm83_vm1, %v101_v43, %v97_v44 }
  0x9e   :  { %v55_v45 = vpop.xlane.xlu0 %54  ;;  %v110_v47 = vrot.slane %v58_v42, %v81_v35  ;;  %v115_v54 = vsel %vm114_vm3, %v102_v51, %v113_v53 }
  0x9f   :  { %v106_v48 = vrot.slane %v55_v45, %v76_v38 }
  0xa1   :  { %v111_v52 = vsel %vm83_vm1, %v110_v47, %v106_v48 }
  0xa2   :  { %v117_v56 = vsel %vm116_vm4, %v111_v52, %v115_v54 }
  0xa6   :  { %v62_v57 = vpop.permute.xlu0 %61 }
  0xa7   :  { %v119_v58 = vmul.f32 %v117_v56, %v62_v57 }
  0xa9   :  { %v120_v59 = vadd.f32 %v119_v58, %v33_v55 }
  0xab   :  { %122 = vst.msk [vmem:[%s210_s2] sm:$0xf] %vm15_vm0, %v120_v59 }

// kernel: _msaf_forward.8
= control target key start
LH: loop header
LB: loop body
LE: loop exit
PB: predicated region body
PF: predicated region fallthrough
CT: control target
= control target key end

     0   :  { %s452_s9 = smov 0   ;;  %s454_s10 = smov 0   ;;  %s488_s0 = inlined_call_operand.vmem [shape: f32[4,16,256], index: 0, kind: input, shape index: {}]   ;;  %s489_s1 = inlined_call_operand.vmem [shape: f32[4,16,1], index: 1, kind: input, shape index: {}]   ;;  %s490_s2 = inlined_call_operand.vmem [shape: f32[4,16,256], index: 2, kind: output, shape index: {}]  }
   0x1   :  { %s456_s11 = smov 0  }
   0x2 LB: > { %s24_s12 = sadd.s32 1, %s430_s10  ;;  %p370_p0 = scmp.ge.s32.totalorder %s434_s11, 1  ;;  %s434_s11 = sphi %s456_s11, %s12_s11   ;;  %s430_s10 = sphi %s454_s10, %s492_s10   ;;  %s426_s9 = sphi %s452_s9, %s491_s9  }
   0x3   : > { %p26_p1 = scmp.ge.s32.totalorder %s24_s12, 2  ;;  %p147_p2 = scmp.lt.s32.totalorder %s434_s11, 3 }
   0x5   : > { %s494_s12 = smov (%p26_p1, %s24_s12), 0  ;;  %p148_p3 = pnand %p370_p0, %p147_p2 }
   0x6   : > { %s371_s13 = sshll.u32 (!%p148_p3), %s426_s9, 1  ;;  %v436_v0 = vmov (!%p148_p3), 0  }
   0x7   : > { %151 = sbr.rel (%p148_p3) target bundleno = 154 (0x9a), region = 28  ;;  %411 = vset.pattern.permute.xlu1 (!%p148_p3), %v436_v0  ;;  %410 = vset.pattern.permute.xlu0 (!%p148_p3), %v436_v0  ;;  %p187_p4 = scmp.lt.s32.totalorder (!%p148_p3), %s371_s13, 3 }
   0xe   : > { %s496_s13 = smov (!%p187_p4, %s371_s13), 3 }
   0xf   : > { %s383_s14 = sshll.u32 %s496_s13, 4  ;;  %s382_s18 = sshll.u32 %s496_s13, 5 }
  0x10   : > { %s202_s17 = scalar_lea.vmem %s489_s1, %s383_s14  ;;  %s194_s21 = scalar_lea.vmem %s488_s0, %s382_s18 }
  0x11   : > { %v226_v1 = vld [vmem:[%s202_s17 + $0x10] sm:$0xff]  ;;  %v224_v2 = vld [vmem:[%s202_s17] sm:$0xff]  ;;  %v227_v3 = vld [vmem:[%s202_s17 + $0x18] sm:$0xff]  ;;  %s213_s24 = scalar_lea.vmem %s490_s2, %s382_s18 }
  0x12   : > { %240 = vperm.xlu1 %411, %v226_v1   ;;  %230 = vperm.xlu0 %410, %v224_v2   ;;  %v225_v4 = vld [vmem:[%s202_s17 + $0x8] sm:$0xff]  ;;  %v220_v5 = vld [vmem:[%s194_s21 + $0x20] sm:$0xff]  ;;  %v222_v15 = vld [vmem:[%s194_s21 + $0x30] sm:$0xff] }
  0x13   : > { %v221_v6 = vld [vmem:[%s194_s21 + $0x28] sm:$0xff]  ;;  %v216_v7 = vld [vmem:[%s194_s21] sm:$0xff]  ;;  %v223_v16 = vld [vmem:[%s194_s21 + $0x38] sm:$0xff] }
  0x14   : > { %v217_v8 = vld [vmem:[%s194_s21 + $0x8] sm:$0xff]  ;;  %v218_v17 = vld [vmem:[%s194_s21 + $0x10] sm:$0xff]  ;;  %v219_v18 = vld [vmem:[%s194_s21 + $0x18] sm:$0xff] }
  0x16   : > { %245 = vperm.xlu1 %411, %v227_v3   ;;  %235 = vperm.xlu0 %410, %v225_v4  }
  0x91   : > { %v241_v9 = vpop.permute.xlu1 %240  ;;  %v231_v10 = vpop.permute.xlu0 %230 }
  0x92   : > { %v252_v11 = vmul.f32 %v241_v9, %v220_v5  ;;  %v253_v12 = vmul.f32 %v241_v9, %v221_v6  ;;  %v248_v13 = vmul.f32 %v231_v10, %v216_v7  ;;  %v249_v14 = vmul.f32 %v231_v10, %v217_v8 }
  0x94   : > { %256 = vst [vmem:[%s213_s24] sm:$0xff] %v248_v13  ;;  %257 = vst [vmem:[%s213_s24 + $0x8] sm:$0xff] %v249_v14 }
  0x95   : > { %260 = vst [vmem:[%s213_s24 + $0x20] sm:$0xff] %v252_v11  ;;  %261 = vst [vmem:[%s213_s24 + $0x28] sm:$0xff] %v253_v12  ;;  %v246_v19 = vpop.permute.xlu1 %245  ;;  %v236_v20 = vpop.permute.xlu0 %235 }
  0x96   : > { %v254_v21 = vmul.f32 %v246_v19, %v222_v15  ;;  %v255_v22 = vmul.f32 %v246_v19, %v223_v16  ;;  %v250_v23 = vmul.f32 %v236_v20, %v218_v17  ;;  %v251_v24 = vmul.f32 %v236_v20, %v219_v18 }
  0x98   : > { %258 = vst [vmem:[%s213_s24 + $0x10] sm:$0xff] %v250_v23  ;;  %259 = vst [vmem:[%s213_s24 + $0x18] sm:$0xff] %v251_v24 }
  0x99   : > { %262 = vst [vmem:[%s213_s24 + $0x30] sm:$0xff] %v254_v21  ;;  %263 = vst [vmem:[%s213_s24 + $0x38] sm:$0xff] %v255_v22 }
  0x9a PF: > { %s12_s11 = sadd.s32 1, %s434_s11   ;;  %s491_s9 = smov %s430_s10 }
  0x9b   : > { %p9_p5 = scmp.ge.s32.totalorder %s12_s11, 4   ;;  %s492_s10 = smov %s494_s12 }
  0x9d   :  { %11 = sbr.rel (!%p9_p5) target bundleno = 2 (0x2), region = 61 }

// kernel: _msaf_forward.7
= control target key start
LH: loop header
LB: loop body
LE: loop exit
PB: predicated region body
PF: predicated region fallthrough
CT: control target
= control target key end

     0   :  { %v465_v0 = vmov 0.0|0.0   ;;  %vm466_vm0 = vmmov 0   ;;  %v467_v3 = vmov 0.0   ;;  %v156_v4 = vlaneseq  ;;  %s473_s16 = smov 96   ;;  %s579_s1 = inlined_call_operand.vmem [shape: f32[16,4], index: 1, kind: input, shape index: {}]   ;;  %s580_s0 = inlined_call_operand.vmem [shape: f32[2,16], index: 0, kind: input, shape index: {}]   ;;  %s581_s5 = inlined_call_operand.vmem [shape: f32[3,4,16], index: 5, kind: input, shape index: {}]   ;;  %s582_s6 = inlined_call_operand.vmem [shape: f32[3,16], index: 6, kind: input, shape index: {}]   ;;  %s583_s2 = inlined_call_operand.vmem [shape: f32[1,4], index: 2, kind: input, shape index: {}]   ;;  %s584_s3 = inlined_call_operand.vmem [shape: f32[1,4], index: 3, kind: input, shape index: {}]   ;;  %s585_s4 = inlined_call_operand.vmem [shape: f32[1,4], index: 4, kind: input, shape index: {}]   ;;  %s586_s7 = inlined_call_operand.vmem [shape: f32[2,3,16], index: 7, kind: output, shape index: {}]  }
   0x1   :  { %442 = vmatprep.subr.bf16.mxu0 %v465_v0  ;;  %v27_v1 = vld [vmem:[%s579_s1] sm:$0xff]  ;;  %v28_v2 = vld [vmem:[%s579_s1 + $0x8] sm:$0xff]  ;;  %434 = vmatprep.mubr.msk.f32.mxu0 %vm466_vm0, %v467_v3  ;;  %v468_v6 = vmov 1983009808   ;;  %vm36_vm1 = vcmask 130048   ;;  %vm228_vm2 = vcmask 261120  }
   0x2   :  { %v443_v5 = vpack.c.bf16 %v28_v2, %v27_v1  ;;  %v154_v7 = vunpack.c.l.s4 %v468_v6  ;;  %437 = vmatprep.subr.mxu1 %v467_v3  ;;  %439 = vmatprep.mubr.msk.f32.mxu1 %vm466_vm0, %v467_v3  ;;  %v157_v8 = vshrl.u32 %v156_v4, 7  ;;  %v26_v9 = vld [vmem:[%s580_s0] sm:$0x3]  ;;  %v469_v12 = vmov 1934713408   ;;  %s470_s0 = smov 16  }
   0x3   :  { %v454_v10 = vld [vmem:[%s581_s5] ss:$8 sps:$4 sm:$0xff]   ;;  %v171_v13 = vunpack.c.l.s4 %v469_v12  ;;  %v420_v15 = vld.sshfl [vmem:[%s581_s5 + $0x4] sm:$0x33 pattern:$0x76325410] }
   0x4   :  { %444 = vmatpush3.bf16.msra.mxu0 %v443_v5  ;;  %v155_v11 = vunpack.c.0.s8 %v154_v7  ;;  %s471_s5 = smov 32   ;;  %vm269_vm3 = vcmask 1043456   ;;  %v422_v36 = vld.sshfl [vmem:[%s582_s6] sm:$0x13 pattern:$0x76325410] }
   0x5   :  { %v172_v16 = vunpack.c.0.s8 %v171_v13  ;;  %v238_v37 = vcombine.low %v422_v36, %v422_v36  ;;  %v239_v39 = vcombine.high %v422_v36, %v422_v36  ;;  %v416_v42 = vld [vmem:[%s583_s2] ss:$0 sm:$0xff]  ;;  %vm110_vm4 = vcmask 25600  }
   0x6   :  { %v529_v14 = vsub.s32 %v155_v11, %v157_v8  ;;  %v418_v2 = vld [vmem:[%s584_s3] ss:$0 sm:$0xff]  ;;  %vm265_vm5 = vcmask 31744   ;;  %s472_s3 = smov 112   ;;  %vm367_vm6 = vcmask 124928  }
   0x7   :  { %435 = vmatmul.mubr.msk.f32.vlgmr.msra.gmra.mrb[0].mxu0 %vm36_vm1, %v26_v9  ;;  %v536_v18 = vsub.s32 %v172_v16, %v157_v8  ;;  %v419_v5 = vld [vmem:[%s585_s4] ss:$0 sm:$0xff] }
   0x8   :  { %v159_v17 = vrot.slane %v454_v10, %v529_v14 }
   0x9   :  { %v246_v38 = vrot.slane %v238_v37, %v536_v18  ;;  %v254_v41 = vrot.slane %v239_v39, %v536_v18 }
   0xa   :  { %v168_v19 = vcombine.low %v159_v17, %v420_v15  ;;  %v169_v20 = vcombine.high %v159_v17, %v420_v15 }
   0xb   :  { %v247_v40 = vcombine.high %v246_v38, %v467_v3 }
   0xc   :  { %v176_v21 = vrot.slane %v168_v19, %v536_v18  ;;  %v183_v22 = vrot.slane %v169_v20, %v536_v18 }
   0xd   :  { %256 = vrot.lane.b32.xlu1 %v247_v40, %s470_s0 }
   0xe   :  { %v186_v23 = vcombine.low %v176_v21, %v183_v22  ;;  %v421_v24 = vcombine.high %v176_v21, %v183_v22 }
  0x10   :  { %v193_v25 = vrot.slane %v186_v23, %v529_v14  ;;  %v201_v26 = vrot.slane %v421_v24, %v529_v14 }
  0x11   :  { %260 = vrot.lane.b32.xlu1 %v254_v41, %s471_s5 }
  0x12   :  { %v202_v27 = vcombine.low %v193_v25, %v201_v26  ;;  %v203_v29 = vcombine.high %v193_v25, %v201_v26 }
  0x14   :  { %v210_v28 = vrot.slane %v202_v27, %v536_v18  ;;  %v218_v31 = vrot.slane %v203_v29, %v536_v18 }
  0x16   :  { %v211_v30 = vcombine.high %v210_v28, %v467_v3 }
  0x18   :  { %220 = vrot.lane.b32.xlu0 %v211_v30, %s470_s0 }
  0x1c   :  { %224 = vrot.lane.b32.xlu0 %v218_v31, %s471_s5 }
  0x7f   :  { %v257_v9 = vpop.permute.xlu1 %256 }
  0x80   :  { %v263_v10 = vsel %vm36_vm1, %v246_v38, %v257_v9 }
  0x83   :  { %v261_v11 = vpop.permute.xlu1 %260 }
  0x84   :  { %v264_v12 = vsel %vm228_vm2, %v263_v10, %v261_v11 }
  0x8a   :  { %v221_v32 = vpop.permute.xlu0 %220 }
  0x8b   :  { %v227_v33 = vsel %vm36_vm1, %v210_v28, %v221_v32 }
  0x8e   :  { %v225_v34 = vpop.permute.xlu0 %224 }
  0x8f   :  { %v229_v35 = vsel %vm228_vm2, %v227_v33, %v225_v34 }
  0x90   :  { %438 = vmatpush3.msk.msra.mxu1 %vm269_vm3, %v229_v35 }
  0xda   :  { %v106_v43 = vpop.f32.mrb[0].mxu0 }
  0xdb   :  { %v107_v44 = vadd.f32 %v416_v42, %v106_v43  ;;  %v436_v45 = vpop.f32.mrb[1].mxu0 }
  0xdd   :  { %v111_v46 = vsel %vm110_vm4, %v107_v44, 0.0 }
  0xde   :  { %v112_v47 = vrot.slane %v111_v46, 4 }
  0xe0   :  { %v113_v48 = vadd.f32 %v112_v47, %v111_v46 }
  0xe2   :  { %v114_v49 = vrot.slane %v113_v48, 2 }
  0xe4   :  { %v115_v50 = vadd.f32 %v114_v49, %v113_v48 }
  0xe6   :  { %v116_v51 = vrot.slane %v115_v50, 1 }
  0xe8   :  { %v117_v52 = vadd.f32 %v116_v51, %v115_v50 }
  0xea   :  { %v119_v53 = vmul.f32 0.5, %v117_v52 }
  0xec   :  { %v120_v54 = vsub.f32 %v107_v44, %v119_v53 }
  0xee   :  { %v121_v55 = vmul.f32 %v120_v54, %v120_v54 }
  0xf0   :  { %v122_v56 = vsel %vm110_vm4, %v121_v55, 0.0 }
  0xf1   :  { %v123_v57 = vrot.slane %v122_v56, 4 }
  0xf3   :  { %v124_v58 = vadd.f32 %v123_v57, %v122_v56 }
  0xf5   :  { %v125_v59 = vrot.slane %v124_v58, 2 }
  0xf7   :  { %v126_v60 = vadd.f32 %v125_v59, %v124_v58 }
  0xf9   :  { %v127_v61 = vrot.slane %v126_v60, 1 }
  0xfb   :  { %v128_v62 = vadd.f32 %v127_v61, %v126_v60 }
  0xfd   :  { %v129_v63 = vmul.f32 0.5, %v128_v62 }
  0xff   :  { %v130_v0 = vadd.f32 1e-05, %v129_v63 }
 0x101   :  { %455 = vrsqrt.f32 %v130_v0 }
 0x10b   :  { %v456_v1 = vpop.eup %455 }
 0x10c   :  { %v132_v4 = vmul.f32 %v456_v1, %v120_v54 }
 0x10e   :  { %v140_v6 = vmul.f32 %v418_v2, %v132_v4 }
 0x110   :  { %v148_v7 = vadd.f32 %v419_v5, %v140_v6 }
 0x112   :  { %v149_v8 = vmax.f32 %v148_v7, 0.0 }
 0x114   :  { %440 = vmatmul.mubr.msk.f32.vlgmr.msra.gmra.mrb[0].mxu1 %vm265_vm5, %v149_v8 }
 0x1e7   :  { %v339_v13 = vpop.f32.mrb[0].mxu1 }
 0x1e8   :  { %v340_v15 = vadd.f32 %v339_v13, %v264_v12  ;;  %v441_v16 = vpop.f32.mrb[1].mxu1 }
 0x1ea   :  { %344 = vrot.lane.b32.xlu1 %v340_v15, %s472_s3  ;;  %346 = vrot.lane.b32.xlu0 %v340_v15, %s473_s16 }
 0x25c   :  { %v347_v17 = vpop.permute.xlu0 %346  ;;  %v345_v21 = vpop.permute.xlu1 %344 }
 0x25d   :  { %v349_v19 = vcombine.low %v340_v15, %v347_v17 }
 0x25f   :  { %v356_v20 = vrot.slane %v349_v19, %v529_v14 }
 0x261   :  { %v358_v22 = vcombine.low %v356_v20, %v345_v21 }
 0x263   :  { %v365_v23 = vrot.slane %v358_v22, %v536_v18 }
 0x265   :  { %v366_v24 = vcombine.high %v365_v23, %v467_v3  ;;  %v368_v25 = vsel %vm367_vm6, %v365_v23, -inf }
 0x266   :  { %v369_v26 = vrot.slane %v368_v25, 4 }
 0x267   :  { %v375_v27 = vsel %vm367_vm6, %v366_v24, -inf }
 0x268   :  { %v370_v28 = vmax.f32 %v368_v25, %v369_v26  ;;  %v376_v29 = vrot.slane %v375_v27, 4 }
 0x26a   :  { %v371_v30 = vrot.slane %v370_v28, 2  ;;  %v377_v31 = vmax.f32 %v375_v27, %v376_v29 }
 0x26c   :  { %v372_v32 = vmax.f32 %v370_v28, %v371_v30  ;;  %v378_v33 = vrot.slane %v377_v31, 2 }
 0x26e   :  { %v373_v34 = vrot.slane %v372_v32, 1  ;;  %v379_v14 = vmax.f32 %v377_v31, %v378_v33 }
 0x270   :  { %v374_v35 = vmax.f32 %v372_v32, %v373_v34  ;;  %v380_v36 = vrot.slane %v379_v14, 1 }
 0x272   :  { %v381_v37 = vmax.f32 %v379_v14, %v380_v36  ;;  %v382_v38 = vsub.f32 %v365_v23, %v374_v35 }
 0x274   :  { %v383_v18 = vsub.f32 %v366_v24, %v381_v37  ;;  %v384_v39 = vmul.f32 1.442695, %v382_v38 }
 0x276   :  { %457 = vpow2.f32 %v384_v39  ;;  %v386_v3 = vmul.f32 1.442695, %v383_v18 }
 0x278   :  { %459 = vpow2.f32 %v386_v3 }
 0x280   :  { %v458_v40 = vpop.eup %457 }
 0x281   :  { %v388_v41 = vsel %vm367_vm6, %v458_v40, 0.0 }
 0x282   :  { %v460_v42 = vpop.eup %459  ;;  %v389_v43 = vrot.slane %v388_v41, 4 }
 0x283   :  { %v395_v44 = vsel %vm367_vm6, %v460_v42, 0.0 }
 0x284   :  { %v390_v45 = vadd.f32 %v389_v43, %v388_v41  ;;  %v396_v46 = vrot.slane %v395_v44, 4 }
 0x286   :  { %v391_v47 = vrot.slane %v390_v45, 2  ;;  %v397_v48 = vadd.f32 %v396_v46, %v395_v44 }
 0x288   :  { %v392_v49 = vadd.f32 %v391_v47, %v390_v45  ;;  %v398_v50 = vrot.slane %v397_v48, 2 }
 0x28a   :  { %v393_v51 = vrot.slane %v392_v49, 1  ;;  %v399_v52 = vadd.f32 %v398_v50, %v397_v48 }
 0x28c   :  { %v394_v53 = vadd.f32 %v393_v51, %v392_v49  ;;  %v400_v54 = vrot.slane %v399_v52, 1 }
 0x28e   :  { %v401_v55 = vadd.f32 %v400_v54, %v399_v52  ;;  %461 = vrcp.f32 %v394_v53 }
 0x290   :  { %463 = vrcp.f32 %v401_v55 }
 0x298   :  { %v462_v56 = vpop.eup %461 }
 0x299   :  { %v403_v57 = vmul.f32 %v462_v56, %v458_v40 }
 0x29a   :  { %v464_v58 = vpop.eup %463 }
 0x29b   :  { %v405_v59 = vmul.f32 %v464_v58, %v460_v42  ;;  %v406_v60 = vmul.f32 0.9, %v403_v57 }
 0x29d   :  { %v407_v61 = vmul.f32 0.9, %v405_v59  ;;  %v408_v62 = vadd.f32 0.1, %v406_v60 }
 0x29f   :  { %v409_v63 = vadd.f32 0.1, %v407_v61  ;;  %410 = vst.msk [vmem:[%s586_s7] sm:$0x7] %vm367_vm6, %v408_v62 }
 0x2a1   :  { %411 = vst.msk [vmem:[%s586_s7 + $0x4] sm:$0x7] %vm367_vm6, %v409_v63 }

// kernel: _msaf_forward.9
= control target key start
LH: loop header
LB: loop body
LE: loop exit
PB: predicated region body
PF: predicated region fallthrough
CT: control target
= control target key end

     0   :  { %7 = vsyncpa [#allocation3], 0  ;;  %s604_s0 = inlined_call_operand.vmem [shape: f32[2,16,128], index: 0, kind: input, shape index: {}]   ;;  %s605_s1 = inlined_call_operand.vmem [shape: f32[2,16,1], index: 1, kind: input, shape index: {}]   ;;  %s606_s2 = inlined_call_operand.hbm [shape: f32[2,16,128], index: 2, kind: output, shape index: {}]  }
   0x1   :  { %9 = vsyncpa [#allocation3 + $0x1], 0  ;;  %s486_s9 = smov 0   ;;  %s488_s10 = smov 0  }
   0x2   :  { %s490_s11 = smov 0   ;;  %s492_s12 = smov 0  }
   0x3   :  { %s494_s13 = smov 0   ;;  %s496_s14 = smov 0  }
   0x4 LB: > { %s310_s15 = sadd.s32 4294967295, %s465_s14   ;;  %s311_s16 = sadd.s32 4294967294, %s465_s14   ;;  %s465_s14 = sphi %s496_s14, %s15_s14   ;;  %s461_s13 = sphi %s494_s13, %s613_s13   ;;  %s457_s12 = sphi %s492_s12, %s612_s12   ;;  %s453_s11 = sphi %s490_s11, %s611_s11   ;;  %s449_s10 = sphi %s488_s10, %s610_s10   ;;  %s445_s9 = sphi %s486_s9, %s609_s9  }
   0x5   : > { %s27_s17 = sadd.s32 1, %s461_s13  ;;  %s90_s18 = sadd.s32 1, %s453_s11 }
   0x6   : > { %p29_p0 = scmp.ge.s32.totalorder %s27_s17, 2  ;;  %p100_p1 = scmp.ne.s32.totalorder %s453_s11, %s449_s10 }
   0x7   : > { %p101_p2 = scmp.eq.s32.totalorder %s310_s15, 1  ;;  %p106_p3 = scmp.ne.s32.totalorder %s449_s10, %s445_s9 }
   0x8   : > { %s615_s17 = smov (%p29_p0, %s27_s17), 0  ;;  %p107_p5 = scmp.eq.s32.totalorder %s311_s16, 1 }
   0x9   : > { %p526_p4 = por %p101_p2, %p100_p1  ;;  %s85_s20 = ssub.s32 %s461_s13, %s615_s17 }
   0xa   : > { %p314_p6 = scmp.ge.s32.totalorder %s465_s14, 1  ;;  %p88_p7 = scmp.eq.s32.totalorder %s85_s20, 0 }
   0xb   : > { %p533_p8 = por %p107_p5, %p106_p3  ;;  %p144_p9 = scmp.lt.s32.totalorder %s465_s14, 3 }
   0xc   : > { %s539_s22 = scalar_select %p88_p7, %s453_s11, %s90_s18  }
   0xd   : > { %p145_p10 = pnand %p314_p6, %p144_p9 }
   0xe   : > { %p174_p11 = scmp.lt.s32.totalorder (!%p145_p10), %s457_s12, 1  ;;  %v467_v0 = vmov (!%p145_p10), 0   ;;  %s171_s28 = sand.u32 (!%p145_p10), 1, %s449_s10  }
   0xf   : > { %148 = sbr.rel (%p145_p10) target bundleno = 176 (0xb0), region = 28  ;;  %386 = vset.pattern.permute.xlu0 (!%p145_p10), %v467_v0  ;;  %s315_s4 = sshll.u32 (!%p145_p10), %s171_s28, 4 }
  0x10   : > { %s173_s5 = scalar_lea.vmem (!%p145_p10), [#allocation2], %s315_s4  ;;  %s327_s7 = sshll.u32 (!%p145_p10), %s457_s12, 8 }
  0x11   : > { %s220_s6 = sshll.u32 (!%p145_p10), %s173_s5, 4  ;;  %s556_s16 = scalar_lea.hbm (!%p145_p10), %s606_s2, %s327_s7  ;;  %s551_s6 = int_to_ptr.vmem [resolvable:$true] %s220_s6 }
  0x12   : > { %s558_s18 = scalar_lea.sflag (!%p145_p10), [#allocation3], %s171_s28  ;;  %s387_s20 = scalar_lea.vmem (!%p145_p10), %s551_s6, 256 }
  0x13   : > { %p388_p12 = scmp.ne.s32.totalorder (!%p145_p10), %s551_s6, %s387_s20 }
  0x15   : > { %p389_p13 = pnand (!%p145_p10), %p388_p12, %p526_p4 }
  0x16   : > { %s175_s23 = scalar_select %p174_p11, %s457_s12, 1 }
  0x17   : > { %p390_p0 = pneg %p389_p13  ;;  %s468_s12 = smov [#allocation2]  }
  0x18   : > { %s325_s24 = sshll.u32 %s175_s23, 4  ;;  %s391_s23 = sshll.u32 %s468_s12, 4  ;;  %s392_s23 = int_to_ptr.vmem [resolvable:$false] %s391_s23 }
  0x19   : > { %s186_s27 = scalar_lea.vmem %s605_s1, %s325_s24  ;;  %s181_s3 = scalar_lea.vmem %s604_s0, %s325_s24 }
  0x1a   : > { %v189_v1 = vld [vmem:[%s186_s27] sm:$0xff]  ;;  %v190_v2 = vld [vmem:[%s186_s27 + $0x8] sm:$0xff]  ;;  %s393_s24 = scalar_lea.vmem %s392_s23, 512  ;;  %p394_p1 = scmp.lt.s32.totalorder %s551_s6, %s392_s23 }
  0x1b   : > { %193 = vperm.xlu0 %386, %v189_v1   ;;  %v187_v3 = vld [vmem:[%s181_s3] sm:$0xff]  ;;  %v188_v6 = vld [vmem:[%s181_s3 + $0x8] sm:$0xff]  ;;  %p395_p2 = scmp.lt.s32.totalorder %s393_s24, %s387_s20 }
  0x1d   : > { %p396_p3 = por %p395_p2, %p394_p1 }
  0x1f   : > { %198 = vperm.xlu0 %386, %v190_v2   ;;  %p397_p5 = pnand %p396_p3, %p390_p0 }
  0x9a   : > { %v194_v4 = vpop.permute.xlu0 %193 }
  0x9b   : > { %v201_v5 = vmul.f32 %v194_v4, %v187_v3 }
  0x9d   : > { %203 = vst [vmem:[%s173_s5] sm:$0xff] %v201_v5 }
  0x9e   : > { %v199_v7 = vpop.permute.xlu0 %198 }
  0x9f   : > { %v202_v8 = vmul.f32 %v199_v7, %v188_v6 }
  0xa1   : > { %204 = vst [vmem:[%s173_s5 + $0x8] sm:$0xff] %v202_v8 }
  0xa2   : > { %400 = shalt.err (!%p397_p5)
}
  0xa3   : > { %s401_s25 = scalar_lea.hbm %s556_s16, 256  ;;  %s405_s28 = scalar_lea.hbm %s606_s2, 512 }
  0xa4   : > { %p402_p6 = scmp.ne.s32.totalorder %s556_s16, %s401_s25  ;;  %p406_p10 = scmp.lt.u32.totalorder %s556_s16, %s606_s2 }
  0xa5   : > { %p407_p11 = scmp.lt.u32.totalorder %s405_s28, %s401_s25  ;;  %p409_p13 = scmp.lt.u32.totalorder %s401_s25, %s556_s16 }
  0xa6   : > { %p403_p7 = pnand %p402_p6, %p526_p4 }
  0xa7   : > { %p408_p12 = por %p407_p11, %p406_p10 }
  0xa8   : > { %p404_p9 = pneg %p403_p7 }
  0xa9   : > { %p410_p0 = por %p409_p13, %p408_p12 }
  0xab   : > { %p411_p1 = pnand %p410_p0, %p404_p9 }
  0xad   : > { %414 = shalt.err (!%p411_p1)
}
  0xae   : > { %s469_s3 = smov 128   ;;  %s470_s4 = smov 8  }
  0xaf   : > { %328 = dma.vmem_to_hbm [thread:$0]  (%p526_p4), %s551_s6, 256, %s556_s16, %s558_s18, %s469_s3, %s469_s3, %s470_s4  }
  0xb0 PF: > { %p334_p2 = scmp.ge.s32.totalorder %s465_s14, 2  ;;  %s235_s5 = sand.u32 1, %s445_s9  }
  0xb1   : > { %s236_s7 = scalar_lea.sflag [#allocation3], %s235_s5 }
  0xb2   : > { %p331_p3 = pnand %p334_p2, %p533_p8 }
  0xb4   : > { %440 = dma.done.wait (!%p331_p3), %s236_s7, 256  }
  0xb5   : > { %442 = vsyncadd (!%p331_p3), %s236_s7, 4294967040  ;;  %s15_s14 = sadd.s32 1, %s465_s14   ;;  %s609_s9 = smov %s449_s10 }
  0xb6   : > { %p12_p5 = scmp.ge.s32.totalorder %s15_s14, 4   ;;  %s610_s10 = smov %s453_s11 }
  0xb7   : > { %s611_s11 = smov %s539_s22  ;;  %s612_s12 = smov %s461_s13 }
  0xb8   : > { %s613_s13 = smov %s615_s17  ;;  %14 = sbr.rel (!%p12_p5) target bundleno = 4 (0x4), region = 66 }
  0xbf   :  { %241 = vsyncpa [#allocation3], 1 }
  0xc0   :  { %243 = vsyncpa [#allocation3 + $0x1], 1 }

</bundles_post_ra>
